<compile_context>
chip_gen: v7x
topology: tpu7x:2x2x1
jax: 0.10.0
libtpu: 0.0.40
codegen_flags: <defaults>
</compile_context>

<pallas_src>
import functools
import math

import jax
import jax.numpy as jnp
from jax import lax
from jax.experimental import pallas as pl
from jax.experimental.pallas import tpu as pltpu

LN2 = math.log(2.0)


def _pick_tm(t_mel, target=512):
    """Largest multiple of 128 <= target that divides T_mel, else T_mel."""
    if t_mel <= target or t_mel % 128 != 0:
        return t_mel
    tm = (target // 128) * 128
    while tm >= 128:
        if t_mel % tm == 0:
            return tm
        tm -= 128
    return t_mel


def _cond_emb_kernel(mel2ph_smem,                 # (B, T_mel) int32, SMEM (prefetch)
                     hub_ref,                     # (1, T_enc, H)  f32
                     f0r_ref,                     # (1, 1, TM)     f32 lane-dense
                     f0c_ref,                     # (1, TM, 1)     f32 column layout
                     emb_ref,                     # (VOCAB, H)     f32
                     dec_ref,                     # (1, TM, H)     f32 out
                     f0d_ref,                     # (1, 1, TM)     f32 out
                     *, f0_bin, f0_mel_min, f0_mel_max):
    b = pl.program_id(0)
    j = pl.program_id(1)
    tm = dec_ref.shape[1]
    t_enc = hub_ref.shape[1]
    vocab = emb_ref.shape[0]
    t0 = j * tm

    # ---- f0_denorm = 2 ** f0 : lane-dense compute + dense (unmasked) store --
    f0d_ref[...] = jnp.exp(f0r_ref[...] * jnp.float32(LN2))

    # ---- f0 -> coarse pitch (column layout: frames on the sublane axis) -----
    f0_denorm = jnp.exp(f0c_ref[0] * jnp.float32(LN2))            # (TM, 1)
    f0_mel = 1127.0 * jnp.log(1.0 + f0_denorm / 700.0)
    scaled = (f0_mel - f0_mel_min) * (f0_bin - 2.0) / (f0_mel_max - f0_mel_min) + 1.0
    f0_mel = jnp.where(f0_mel > 0.0, scaled, f0_mel)
    f0_mel = jnp.where(f0_mel <= 1.0, 1.0, f0_mel)
    f0_mel = jnp.where(f0_mel > f0_bin - 1.0, f0_bin - 1.0, f0_mel)
    pitch = jnp.floor(f0_mel + 0.5).astype(jnp.int32)             # (TM, 1) in [1, 255]

    # ---- pitch embedding: (TM, VOCAB) one-hot @ (VOCAB, H) on the MXU -------
    oh = (jax.lax.broadcasted_iota(jnp.int32, (tm, vocab), 1)
          == pitch).astype(jnp.float32)
    pitch_emb = jnp.dot(oh, emb_ref[...], preferred_element_type=jnp.float32)

    dec2d = dec_ref.at[0]                                         # (TM, H) view
    hub2d = hub_ref.at[0]                                         # (T_enc, H) view
    dec2d[...] = pitch_emb.astype(dec_ref.dtype)

    # ---- hubert time gather + add + nonpadding mask, row by row -------------
    # mel2ph == 0 marks padding (whole output row forced to 0); otherwise the
    # decoder row is hubert[mel2ph - 1]  (== gather from the F.pad'ed tensor).
    def body(t, carry):
        idx = mel2ph_smem[b, t0 + t]                              # int32 scalar
        src = jnp.minimum(jnp.maximum(idx - 1, 0), t_enc - 1)
        hub_row = hub2d[pl.ds(src, 1), :]                         # (1, H)
        cur = dec2d[pl.ds(t, 1), :]                               # (1, H) pitch emb
        valid = (idx > 0).astype(jnp.float32)
        dec2d[pl.ds(t, 1), :] = (cur + hub_row) * valid
        return carry

    lax.fori_loop(0, tm, body, 0)


def condition_embedding_forward(hubert, mel2ph, f0, pitch_embed_weight, hparams):
    """Pallas implementation of ConditionEmbedding.forward.

    Returns a dict with 'decoder_inp' [B, T_mel, H] and 'f0_denorm' [B, T_mel].
    """
    B, T_enc, H = hubert.shape
    T_mel = mel2ph.shape[1]

    f0_bin = int(hparams['f0_bin'])
    f0_min = float(hparams['f0_min'])
    f0_max = float(hparams['f0_max'])
    f0_mel_min = 1127.0 * math.log(1.0 + f0_min / 700.0)
    f0_mel_max = 1127.0 * math.log(1.0 + f0_max / 700.0)

    # pitch is clamped to [1, f0_bin - 1]; table rows >= f0_bin are never hit,
    # so slice to an MXU-friendly vocab (256 for the default hparams).
    vocab = min(int(pitch_embed_weight.shape[0]), f0_bin)
    emb = pitch_embed_weight[:vocab]
    if emb.dtype != jnp.float32:
        emb = emb.astype(jnp.float32)

    hub = hubert if hubert.dtype == jnp.float32 else hubert.astype(jnp.float32)
    mel2ph_i = mel2ph.astype(jnp.int32)
    f0_f = f0 if f0.dtype == jnp.float32 else f0.astype(jnp.float32)
    f0_row = f0_f[:, None, :]                    # (B, 1, T_mel)  lane-dense
    f0_col = f0_f[:, :, None]                    # (B, T_mel, 1)  column (pitch path)

    TM = _pick_tm(T_mel)
    n_t = T_mel // TM

    kernel = functools.partial(_cond_emb_kernel, f0_bin=float(f0_bin),
                               f0_mel_min=f0_mel_min, f0_mel_max=f0_mel_max)

    grid_spec = pltpu.PrefetchScalarGridSpec(
        num_scalar_prefetch=1,                   # mel2ph -> SMEM (gather indices)
        grid=(B, n_t),
        in_specs=[
            pl.BlockSpec((1, T_enc, H), lambda b, j, m2p: (b, 0, 0)),   # hubert
            pl.BlockSpec((1, 1, TM),    lambda b, j, m2p: (b, 0, j)),   # f0 (row)
            pl.BlockSpec((1, TM, 1),    lambda b, j, m2p: (b, j, 0)),   # f0 (col)
            pl.BlockSpec((vocab, H),    lambda b, j, m2p: (0, 0)),      # pitch table
        ],
        out_specs=(
            pl.BlockSpec((1, TM, H), lambda b, j, m2p: (b, j, 0)),      # decoder_inp
            pl.BlockSpec((1, 1, TM), lambda b, j, m2p: (b, 0, j)),      # f0_denorm
        ),
    )

    # TODO(synk): emit decoder_inp as bfloat16 (halves the dominant HBM
    # writeback) if downstream consumers accept it; kept f32 to match the
    # PyTorch module exactly.
    dec, f0d = pl.pallas_call(
        kernel,
        out_shape=(jax.ShapeDtypeStruct((B, T_mel, H), jnp.float32),
                   jax.ShapeDtypeStruct((B, 1, T_mel), jnp.float32)),
        grid_spec=grid_spec,
        compiler_params=pltpu.CompilerParams(
            dimension_semantics=("parallel", "parallel")),
    )(mel2ph_i, hub, f0_row, f0_col, emb)

    return {'decoder_inp': dec, 'f0_denorm': f0d[:, 0, :]}


def _reference_forward(hubert, mel2ph, f0, pitch_embed_weight, hparams):
    """Pure-JAX reference mirroring the PyTorch forward semantics."""
    f0_bin = float(hparams['f0_bin'])
    f0_min = float(hparams['f0_min'])
    f0_max = float(hparams['f0_max'])
    f0_mel_min = 1127.0 * math.log(1.0 + f0_min / 700.0)
    f0_mel_max = 1127.0 * math.log(1.0 + f0_max / 700.0)

    hub_padded = jnp.pad(hubert, ((0, 0), (1, 0), (0, 0)))
    dec = jnp.take_along_axis(hub_padded, mel2ph[:, :, None], axis=1)

    f0_denorm = jnp.exp(f0 * LN2)
    f0_mel = 1127.0 * jnp.log(1.0 + f0_denorm / 700.0)
    scaled = (f0_mel - f0_mel_min) * (f0_bin - 2.0) / (f0_mel_max - f0_mel_min) + 1.0
    f0_mel = jnp.where(f0_mel > 0.0, scaled, f0_mel)
    f0_mel = jnp.where(f0_mel <= 1.0, 1.0, f0_mel)
    f0_mel = jnp.where(f0_mel > f0_bin - 1.0, f0_bin - 1.0, f0_mel)
    pitch = jnp.floor(f0_mel + 0.5).astype(jnp.int32)
    pitch_emb = pitch_embed_weight[pitch]

    mask = (mel2ph > 0).astype(jnp.float32)[:, :, None]
    return {'decoder_inp': (dec + pitch_emb) * mask, 'f0_denorm': f0_denorm}


if __name__ == "__main__":
    hparams = {
        'hidden_size': 32,
        'audio_num_mel_bins': 80,
        'f0_bin': 256,
        'f0_min': 40.0,
        'f0_max': 800.0,
        'use_hubert_soft': True,
        'hubert_vec_dim': 256,
    }

    B, T_enc, T_mel, H = 2, 8, 16, hparams['hidden_size']

    key = jax.random.PRNGKey(0)
    k_hub, k_mel, k_f0, k_emb = jax.random.split(key, 4)

    hubert = jax.random.normal(k_hub, (B, T_enc, H), dtype=jnp.float32)
    # mel2ph in [0, T_enc] (0 = padding frame)
    mel2ph = jax.random.randint(k_mel, (B, T_mel), 0, T_enc + 1, dtype=jnp.int32)
    # normalized log2-f0; denorm -> [~80 Hz, ~600 Hz], coarse index in [1, 255]
    f0 = jax.random.uniform(k_f0, (B, T_mel), dtype=jnp.float32,
                            minval=math.log2(80.0), maxval=math.log2(600.0))

    # nn.Embedding(300, hidden_size, padding_idx=0), normal(0, H**-0.5) init,
    # padding row zeroed -- deterministic synthetic init.
    pitch_embed_weight = (jax.random.normal(k_emb, (300, H), dtype=jnp.float32)
                          * (H ** -0.5))
    pitch_embed_weight = pitch_embed_weight.at[0].set(0.0)

    ret = condition_embedding_forward(hubert, mel2ph, f0, pitch_embed_weight, hparams)
    jax.block_until_ready(ret['decoder_inp'])
    jax.block_until_ready(ret['f0_denorm'])

    ref = _reference_forward(hubert, mel2ph, f0, pitch_embed_weight, hparams)
    assert jnp.allclose(ret['decoder_inp'], ref['decoder_inp'], atol=1e-5, rtol=1e-5)
    assert jnp.allclose(ret['f0_denorm'], ref['f0_denorm'], atol=1e-5, rtol=1e-5)

    print("KERNEL_OK")
</pallas_src>

<mosaic_0001>
module attributes {stable_mosaic.version = 11 : i64} {
  func.func @_cond_emb_kernel(%arg0: i32, %arg1: i32, %arg2: memref<2x16xi32, #tpu.memory_space<smem>>, %arg3: memref<1x8x32xf32, #tpu.memory_space<vmem>>, %arg4: memref<1x1x16xf32, #tpu.memory_space<vmem>>, %arg5: memref<1x16x1xf32, #tpu.memory_space<vmem>>, %arg6: memref<256x32xf32, #tpu.memory_space<vmem>>, %arg7: memref<1x16x32xf32, #tpu.memory_space<vmem>>, %arg8: memref<1x1x16xf32, #tpu.memory_space<vmem>>) attributes {dimension_semantics = [#tpu.dimension_semantics<parallel>, #tpu.dimension_semantics<parallel>], iteration_bounds = array<i64: 2, 1>, scalar_prefetch = 1 : i64, scratch_operands = 0 : i64, tpu.core_type = #tpu.core_type<tc>, window_params = [{transform_indices = @transform_0, window_bounds = array<i64: 1, 8, 32>}, {transform_indices = @transform_1, window_bounds = array<i64: 1, 1, 16>}, {transform_indices = @transform_2, window_bounds = array<i64: 1, 16, 1>}, {pipeline_mode = #tpu.pipeline_mode<synchronous>, transform_indices = @transform_3, window_bounds = array<i64: 256, 32>}, {transform_indices = @transform_4, window_bounds = array<i64: 1, 16, 32>}, {transform_indices = @transform_5, window_bounds = array<i64: 1, 1, 16>}]} {
    %c16_i32 = arith.constant 16 : i32
    %0 = arith.muli %arg1, %c16_i32 : i32
    %c0 = arith.constant 0 : index
    %c0_0 = arith.constant 0 : index
    %c0_1 = arith.constant 0 : index
    %1 = vector.load %arg4[%c0, %c0_0, %c0_1] : memref<1x1x16xf32, #tpu.memory_space<vmem>>, vector<1x1x16xf32>
    %cst = arith.constant 0.693147182 : f32
    %2 = vector.broadcast %cst : f32 to vector<1x1x16xf32>
    %3 = arith.mulf %1, %2 : vector<1x1x16xf32>
    %4 = math.exp %3 : vector<1x1x16xf32>
    %c0_2 = arith.constant 0 : index
    %c0_3 = arith.constant 0 : index
    %c0_4 = arith.constant 0 : index
    %5 = vector.load %arg8[%c0_2, %c0_3, %c0_4] : memref<1x1x16xf32, #tpu.memory_space<vmem>>, vector<1x1x16xf32>
    tpu.vector_store %arg8[%c0_2, %c0_3, %c0_4], %4 {strides = array<i32>} : memref<1x1x16xf32, #tpu.memory_space<vmem>>, vector<1x1x16xf32>,
    %c0_5 = arith.constant 0 : index
    %c0_6 = arith.constant 0 : index
    %c0_7 = arith.constant 0 : index
    %6 = vector.load %arg5[%c0_5, %c0_6, %c0_7] : memref<1x16x1xf32, #tpu.memory_space<vmem>>, vector<1x16x1xf32>
    %7 = vector.shape_cast %6 : vector<1x16x1xf32> to vector<16x1xf32>
    %cst_8 = arith.constant 0.693147182 : f32
    %8 = vector.broadcast %cst_8 : f32 to vector<16x1xf32>
    %9 = arith.mulf %7, %8 : vector<16x1xf32>
    %10 = math.exp %9 : vector<16x1xf32>
    %cst_9 = arith.constant 7.000000e+02 : f32
    %11 = vector.broadcast %cst_9 : f32 to vector<16x1xf32>
    %12 = arith.divf %10, %11 : vector<16x1xf32>
    %cst_10 = arith.constant 1.000000e+00 : f32
    %13 = vector.broadcast %cst_10 : f32 to vector<16x1xf32>
    %14 = arith.addf %13, %12 : vector<16x1xf32>
    %15 = math.log %14 : vector<16x1xf32>
    %cst_11 = arith.constant 1.127000e+03 : f32
    %16 = vector.broadcast %cst_11 : f32 to vector<16x1xf32>
    %17 = arith.mulf %16, %15 : vector<16x1xf32>
    %cst_12 = arith.constant 62.627224 : f32
    %18 = vector.broadcast %cst_12 : f32 to vector<16x1xf32>
    %19 = arith.subf %17, %18 : vector<16x1xf32>
    %cst_13 = arith.constant 2.540000e+02 : f32
    %20 = vector.broadcast %cst_13 : f32 to vector<16x1xf32>
    %21 = arith.mulf %19, %20 : vector<16x1xf32>
    %cst_14 = arith.constant 796.304626 : f32
    %22 = vector.broadcast %cst_14 : f32 to vector<16x1xf32>
    %23 = arith.divf %21, %22 : vector<16x1xf32>
    %cst_15 = arith.constant 1.000000e+00 : f32
    %24 = vector.broadcast %cst_15 : f32 to vector<16x1xf32>
    %25 = arith.addf %23, %24 : vector<16x1xf32>
    %cst_16 = arith.constant 0.000000e+00 : f32
    %26 = vector.broadcast %cst_16 : f32 to vector<16x1xf32>
    %27 = arith.cmpf ogt, %17, %26 : vector<16x1xf32>
    %28 = arith.select %27, %25, %17 : vector<16x1xi1>, vector<16x1xf32>
    %cst_17 = arith.constant 1.000000e+00 : f32
    %29 = vector.broadcast %cst_17 : f32 to vector<16x1xf32>
    %30 = arith.cmpf ole, %28, %29 : vector<16x1xf32>
    %cst_18 = arith.constant 1.000000e+00 : f32
    %31 = vector.broadcast %cst_18 : f32 to vector<16x1xf32>
    %32 = arith.select %30, %31, %28 : vector<16x1xi1>, vector<16x1xf32>
    %cst_19 = arith.constant 2.550000e+02 : f32
    %33 = vector.broadcast %cst_19 : f32 to vector<16x1xf32>
    %34 = arith.cmpf ogt, %32, %33 : vector<16x1xf32>
    %cst_20 = arith.constant 2.550000e+02 : f32
    %35 = vector.broadcast %cst_20 : f32 to vector<16x1xf32>
    %36 = arith.select %34, %35, %32 : vector<16x1xi1>, vector<16x1xf32>
    %cst_21 = arith.constant 5.000000e-01 : f32
    %37 = vector.broadcast %cst_21 : f32 to vector<16x1xf32>
    %38 = arith.addf %36, %37 : vector<16x1xf32>
    %39 = math.floor %38 : vector<16x1xf32>
    %40 = arith.fptosi %39 : vector<16x1xf32> to vector<16x1xi32>
    %41 = tpu.iota {dimensions = array<i32: 1>} : vector<16x256xi32>
    %42 = vector.broadcast %40 : vector<16x1xi32> to vector<16x256xi32>
    %43 = arith.cmpi eq, %41, %42 : vector<16x256xi32>
    %44 = arith.extui %43 : vector<16x256xi1> to vector<16x256xi32>
    %45 = arith.sitofp %44 : vector<16x256xi32> to vector<16x256xf32>
    %c0_22 = arith.constant 0 : index
    %c0_23 = arith.constant 0 : index
    %46 = vector.load %arg6[%c0_22, %c0_23] : memref<256x32xf32, #tpu.memory_space<vmem>>, vector<256x32xf32>
    %cst_24 = arith.constant dense<0.000000e+00> : vector<16x32xf32>
    %47 = tpu.matmul %45, %46, %cst_24 {dimension_numbers = #tpu.dot_dimension_numbers<[1], [0], [0], [1], [0, 0, 1, 1], [], []>} : vector<16x256xf32>, vector<256x32xf32>, vector<16x32xf32> -> vector<16x32xf32>
    %c0_25 = arith.constant 0 : index
    %c0_26 = arith.constant 0 : index
    %c0_27 = arith.constant 0 : index
    %48 = vector.load %arg7[%c0_25, %c0_26, %c0_27] : memref<1x16x32xf32, #tpu.memory_space<vmem>>, vector<1x16x32xf32>
    %49 = vector.shape_cast %48 : vector<1x16x32xf32> to vector<16x32xf32>
    %50 = vector.shape_cast %47 : vector<16x32xf32> to vector<1x16x32xf32>
    tpu.vector_store %arg7[%c0_25, %c0_26, %c0_27], %50 {strides = array<i32>} : memref<1x16x32xf32, #tpu.memory_space<vmem>>, vector<1x16x32xf32>,
    %c0_i32 = arith.constant 0 : i32
    %c0_i32_28 = arith.constant 0 : i32
    %c0_i32_29 = arith.constant 0 : i32
    %c16_i32_30 = arith.constant 16 : i32
    %51 = arith.addi %c0_i32_29, %c16_i32_30 : i32
    %c1_i32 = arith.constant 1 : i32
    scf.for %arg9 = %c0_i32_29 to %51 step %c1_i32  : i32 {
      %52 = arith.addi %0, %arg9 : i32
      %53 = arith.index_cast %arg0 : i32 to index
      %54 = arith.index_cast %52 : i32 to index
      %55 = memref.load %arg2[%53, %54] : memref<2x16xi32, #tpu.memory_space<smem>>
      %c1_i32_32 = arith.constant 1 : i32
      %56 = arith.subi %55, %c1_i32_32 : i32
      %c0_i32_33 = arith.constant 0 : i32
      %57 = arith.maxsi %56, %c0_i32_33 : i32
      %c7_i32 = arith.constant 7 : i32
      %58 = arith.minsi %57, %c7_i32 : i32
      %c0_i32_34 = arith.constant 0 : i32
      %c0_i32_35 = arith.constant 0 : i32
      %59 = tpu.memref_slice %arg3[%c0_i32, %c0_i32_34, %c0_i32_35] : memref<1x8x32xf32, #tpu.memory_space<vmem>> -> memref<1x8x32xf32, #tpu.memory_space<vmem>>
      %60 = tpu.memref_squeeze %59 : memref<1x8x32xf32, #tpu.memory_space<vmem>> -> memref<8x32xf32, #tpu.memory_space<vmem>>
      %61 = arith.index_cast %58 : i32 to index
      %c0_36 = arith.constant 0 : index
      %62 = vector.load %60[%61, %c0_36] : memref<8x32xf32, #tpu.memory_space<vmem>>, vector<1x32xf32>
      %c0_i32_37 = arith.constant 0 : i32
      %c0_i32_38 = arith.constant 0 : i32
      %63 = tpu.memref_slice %arg7[%c0_i32_28, %c0_i32_37, %c0_i32_38] : memref<1x16x32xf32, #tpu.memory_space<vmem>> -> memref<1x16x32xf32, #tpu.memory_space<vmem>>
      %64 = tpu.memref_squeeze %63 : memref<1x16x32xf32, #tpu.memory_space<vmem>> -> memref<16x32xf32, #tpu.memory_space<vmem>>
      %65 = arith.index_cast %arg9 : i32 to index
      %c0_39 = arith.constant 0 : index
      %66 = vector.load %64[%65, %c0_39] : memref<16x32xf32, #tpu.memory_space<vmem>>, vector<1x32xf32>
      %c0_i32_40 = arith.constant 0 : i32
      %67 = arith.cmpi sgt, %55, %c0_i32_40 : i32
      %68 = arith.extui %67 : i1 to i32
      %69 = arith.sitofp %68 : i32 to f32
      %70 = arith.addf %66, %62 : vector<1x32xf32>
      %71 = vector.broadcast %69 : f32 to vector<1x32xf32>
      %72 = arith.mulf %70, %71 : vector<1x32xf32>
      %c0_i32_41 = arith.constant 0 : i32
      %c0_i32_42 = arith.constant 0 : i32
      %73 = tpu.memref_slice %arg7[%c0_i32_28, %c0_i32_41, %c0_i32_42] : memref<1x16x32xf32, #tpu.memory_space<vmem>> -> memref<1x16x32xf32, #tpu.memory_space<vmem>>
      %74 = tpu.memref_squeeze %73 : memref<1x16x32xf32, #tpu.memory_space<vmem>> -> memref<16x32xf32, #tpu.memory_space<vmem>>
      %75 = arith.index_cast %arg9 : i32 to index
      %c0_43 = arith.constant 0 : index
      %76 = vector.load %74[%75, %c0_43] : memref<16x32xf32, #tpu.memory_space<vmem>>, vector<1x32xf32>
      tpu.vector_store %74[%75, %c0_43], %72 {strides = array<i32>} : memref<16x32xf32, #tpu.memory_space<vmem>>, vector<1x32xf32>,
    }
    %c16_i32_31 = arith.constant 16 : i32
    return
  }
  func.func @transform_0(%arg0: i32, %arg1: i32, %arg2: memref<2x16xi32, #tpu.memory_space<smem>>) -> (i32, i32, i32) {
    %c0_i32 = arith.constant 0 : i32
    %c0_i32_0 = arith.constant 0 : i32
    %c0_i32_1 = arith.constant 0 : i32
    return %arg0, %c0_i32, %c0_i32_0 : i32, i32, i32
  }
  func.func @transform_1(%arg0: i32, %arg1: i32, %arg2: memref<2x16xi32, #tpu.memory_space<smem>>) -> (i32, i32, i32) {
    %c0_i32 = arith.constant 0 : i32
    %c0_i32_0 = arith.constant 0 : i32
    return %arg0, %c0_i32, %arg1 : i32, i32, i32
  }
  func.func @transform_2(%arg0: i32, %arg1: i32, %arg2: memref<2x16xi32, #tpu.memory_space<smem>>) -> (i32, i32, i32) {
    %c0_i32 = arith.constant 0 : i32
    %c0_i32_0 = arith.constant 0 : i32
    return %arg0, %arg1, %c0_i32 : i32, i32, i32
  }
  func.func @transform_3(%arg0: i32, %arg1: i32, %arg2: memref<2x16xi32, #tpu.memory_space<smem>>) -> (i32, i32) {
    %c0_i32 = arith.constant 0 : i32
    %c0_i32_0 = arith.constant 0 : i32
    %c0_i32_1 = arith.constant 0 : i32
    return %c0_i32, %c0_i32_0 : i32, i32
  }
  func.func @transform_4(%arg0: i32, %arg1: i32, %arg2: memref<2x16xi32, #tpu.memory_space<smem>>) -> (i32, i32, i32) {
    %c0_i32 = arith.constant 0 : i32
    %c0_i32_0 = arith.constant 0 : i32
    return %arg0, %arg1, %c0_i32 : i32, i32, i32
  }
  func.func @transform_5(%arg0: i32, %arg1: i32, %arg2: memref<2x16xi32, #tpu.memory_space<smem>>) -> (i32, i32, i32) {
    %c0_i32 = arith.constant 0 : i32
    %c0_i32_0 = arith.constant 0 : i32
    return %arg0, %c0_i32, %arg1 : i32, i32, i32
  }
}

</mosaic_0001>

<bundles_post_ra>
// kernel: tpu_custom_call.1
= control target key start
LH: loop header
LB: loop body
LE: loop exit
PB: predicated region body
PF: predicated region fallthrough
CT: control target
= control target key end

     0   :  { %s1362_s0 = inlined_call_operand.vmem [shape: s32[2,16], index: 0, kind: input, shape index: {}]   ;;  %s1363_s1 = inlined_call_operand.vmem [shape: f32[2,8,32], index: 1, kind: input, shape index: {}]   ;;  %s1364_s2 = inlined_call_operand.vmem [shape: f32[2,1,16], index: 2, kind: input, shape index: {}]   ;;  %s1365_s3 = inlined_call_operand.vmem [shape: f32[2,16,1], index: 3, kind: input, shape index: {}]   ;;  %s1366_s4 = inlined_call_operand.vmem [shape: f32[256,32], index: 4, kind: input, shape index: {}]   ;;  %s1367_s5 = inlined_call_operand.hbm [shape: f32[2,16,32], index: 5, kind: output, shape index: {0}]   ;;  %s1368_s6 = inlined_call_operand.hbm [shape: f32[2,1,16], index: 6, kind: output, shape index: {1}]  }
   0x1   :  { %1370 = sst [smem:[#allocation11_spill]] %s1363_s1  ;;  %s12_s23 = sshll.u32 %s1362_s0, 4  ;;  %s13_s23 = int_to_ptr.vmem [resolvable:$true] %s12_s23 }
   0x2   :  { %1371 = sst [smem:[#allocation12_spill]] %s1364_s2  ;;  %s914_s24 = scalar_lea.vmem %s13_s23, 32 }
   0x3   :  { %p915_p0 = scmp.ne.s32.totalorder %s13_s23, %s914_s24  ;;  %p919_p1 = scmp.lt.s32.totalorder %s13_s23, %s13_s23 }
   0x4   :  { %p920_p2 = scmp.lt.s32.totalorder %s914_s24, %s914_s24 }
   0x6   :  { %p921_p3 = por %p920_p2, %p919_p1 }
   0x8   :  { %p922_p4 = pnand %p921_p3, %p915_p0 }
   0xa   :  { %925 = shalt.err (!%p922_p4)  }
   0xb   :  { %s1048_s25 = smov [#allocation3]  }
   0xc   :  { %15 = dma.vmem_to_smem %s13_s23, 32, %s1048_s25, [#allocation2] }
   0xd   :  { %1010 = dma.done.wait [#allocation2], 32 }
   0xe   :  { %1011 = vsyncadd [#allocation2], 4294967264 }
   0xf   :  { %17 = sfence }
  0x10   :  { %18 = vsyncpa [#allocation5], 0 }
  0x11   :  { %20 = vsyncpa [#allocation5 + $0x1], 0 }
  0x12   :  { %21 = vsyncpa [#allocation7], 0 }
  0x13   :  { %23 = vsyncpa [#allocation7 + $0x1], 0  ;;  %s1093_s26 = smov 0   ;;  %s1095_s0 = smov 0  }
  0x14   :  { %s1097_s27 = smov 0   ;;  %s1099_s28 = smov 0  }
  0x15   :  { %s1101_s29 = smov 0   ;;  %s1103_s30 = smov 0  }
  0x16 LB: > { %s704_s7 = sadd.s32 4294967295, %s1042_s30   ;;  %s705_s8 = sadd.s32 4294967294, %s1042_s30   ;;  %s1042_s30 = sphi %s1103_s30, %s29_s30   ;;  %s1038_s29 = sphi %s1101_s29, %s1381_s29   ;;  %s1034_s28 = sphi %s1099_s28, %s1380_s28   ;;  %s1030_s27 = sphi %s1097_s27, %s1379_s27   ;;  %s1026_s0 = sphi %s1095_s0, %s1378_s0   ;;  %s1022_s26 = sphi %s1093_s26, %s1377_s26  }
  0x17   : > { %s41_s9 = sadd.s32 1, %s1038_s29  ;;  %s153_s10 = sadd.s32 1, %s1030_s27 }
  0x18   : > { %p43_p5 = scmp.ge.s32.totalorder %s41_s9, 2  ;;  %p163_p6 = scmp.ne.s32.totalorder %s1030_s27, %s1026_s0 }
  0x19   : > { %p164_p7 = scmp.eq.s32.totalorder %s704_s7, 1  ;;  %p169_p8 = scmp.ne.s32.totalorder %s1026_s0, %s1022_s26 }
  0x1a   : > { %s1383_s9 = smov (%p43_p5, %s41_s9), 0  ;;  %p170_p10 = scmp.eq.s32.totalorder %s705_s8, 1 }
  0x1b   : > { %p1133_p9 = por %p164_p7, %p163_p6  ;;  %s148_s12 = ssub.s32 %s1038_s29, %s1383_s9 }
  0x1c   : > { %p708_p11 = scmp.ge.s32.totalorder %s1042_s30, 1  ;;  %p151_p12 = scmp.eq.s32.totalorder %s148_s12, 0 }
  0x1d   : > { %p1140_p13 = por %p170_p10, %p169_p8  ;;  %p248_p0 = scmp.lt.s32.totalorder %s1042_s30, 3 }
  0x1e   : > { %s1146_s14 = scalar_select %p151_p12, %s1030_s27, %s153_s10  }
  0x1f   : > { %p249_p1 = pnand %p708_p11, %p248_p0 }
  0x20   : > { %p294_p2 = scmp.lt.s32.totalorder (!%p249_p1), %s1034_s28, 1  ;;  %v405_v0 = vld [vmem:[%s1366_s4 + $0x80] sm:$0xff] (!%p249_p1)  ;;  %v406_v1 = vld [vmem:[%s1366_s4 + $0x88] sm:$0xff] (!%p249_p1)  ;;  %v1049_v3 = vmov (!%p249_p1), 0   ;;  %v407_v6 = vld [vmem:[%s1366_s4 + $0x90] sm:$0xff] (!%p249_p1)  ;;  %s1374_s1 = sld [smem:[#allocation11_spill]] (!%p249_p1) }
  0x21   : > { %252 = sbr.rel (%p249_p1) target bundleno = 517 (0x205), region = 36  ;;  %v389_v2 = vld [vmem:[%s1366_s4] sm:$0xff] (!%p249_p1)  ;;  %903 = vset.pattern.permute.xlu0 (!%p249_p1), %v1049_v3  ;;  %v778_v4 = vpack.c.bf16 (!%p249_p1), %v406_v1, %v405_v0  ;;  %v390_v5 = vld [vmem:[%s1366_s4 + $0x8] sm:$0xff] (!%p249_p1)  ;;  %v408_v7 = vld [vmem:[%s1366_s4 + $0x98] sm:$0xff] (!%p249_p1)  ;;  %s1375_s2 = sld [smem:[#allocation12_spill]] (!%p249_p1)  ;;  %vm320_vm10 = vcmask (!%p249_p1), 122880  }
  0x22   : > { %v780_v8 = vpack.c.bf16 (!%p249_p1), %v390_v5, %v389_v2  ;;  %v782_v9 = vpack.c.bf16 (!%p249_p1), %v408_v7, %v407_v6  ;;  %v391_v10 = vld [vmem:[%s1366_s4 + $0x10] sm:$0xff] (!%p249_p1)  ;;  %v392_v11 = vld [vmem:[%s1366_s4 + $0x18] sm:$0xff] (!%p249_p1)  ;;  %v409_v12 = vld [vmem:[%s1366_s4 + $0xa0] sm:$0xff] (!%p249_p1)  ;;  %s1263_s23 = sand.u32 (!%p249_p1), 1, %s1026_s0   ;;  %vm496_vm11 = vcmask (!%p249_p1), 261120  }
  0x23   : > { %779 = vmatprep.subr.bf16.mxu0 (!%p249_p1), %v778_v4  ;;  %810 = vmatprep.subr.bf16.mxu1 (!%p249_p1), %v778_v4  ;;  %v410_v13 = vld [vmem:[%s1366_s4 + $0xa8] sm:$0xff] (!%p249_p1)  ;;  %v784_v14 = vpack.c.bf16 (!%p249_p1), %v392_v11, %v391_v10  ;;  %v393_v16 = vld [vmem:[%s1366_s4 + $0x20] sm:$0xff] (!%p249_p1)  ;;  %v411_v18 = vld [vmem:[%s1366_s4 + $0xb0] sm:$0xff] (!%p249_p1)  ;;  %s1369_s24 = scalar_lea.vmem (!%p249_p1), [#allocation6], %s1263_s23  ;;  %s709_s7 = sshll.u32 (!%p249_p1), %s1263_s23, 4 }
  0x24   : > { %781 = vmatpush3.bf16.msra.mxu0 (!%p249_p1), %v780_v8  ;;  %818 = vmatpush3.bf16.msra.mxu1 (!%p249_p1), %v780_v8  ;;  %v786_v15 = vpack.c.bf16 (!%p249_p1), %v410_v13, %v409_v12  ;;  %v394_v17 = vld [vmem:[%s1366_s4 + $0x28] sm:$0xff] (!%p249_p1)  ;;  %v412_v21 = vld [vmem:[%s1366_s4 + $0xb8] sm:$0xff] (!%p249_p1)  ;;  %v395_v28 = vld [vmem:[%s1366_s4 + $0x30] sm:$0xff] (!%p249_p1) }
  0x25   : > { %783 = vmatprep.subr.bf16.mxu0 (!%p249_p1), %v782_v9  ;;  %811 = vmatprep.subr.bf16.mxu1 (!%p249_p1), %v782_v9  ;;  %v788_v24 = vpack.c.bf16 (!%p249_p1), %v394_v17, %v393_v16  ;;  %v790_v27 = vpack.c.bf16 (!%p249_p1), %v412_v21, %v411_v18  ;;  %v396_v29 = vld [vmem:[%s1366_s4 + $0x38] sm:$0xff] (!%p249_p1)  ;;  %v413_v30 = vld [vmem:[%s1366_s4 + $0xc0] sm:$0xff] (!%p249_p1)  ;;  %v414_v31 = vld [vmem:[%s1366_s4 + $0xc8] sm:$0xff] (!%p249_p1) }
  0x26   : > { %v792_v32 = vpack.c.bf16 (!%p249_p1), %v396_v29, %v395_v28  ;;  %v794_v33 = vpack.c.bf16 (!%p249_p1), %v414_v31, %v413_v30  ;;  %v397_v34 = vld [vmem:[%s1366_s4 + $0x40] sm:$0xff] (!%p249_p1)  ;;  %v398_v35 = vld [vmem:[%s1366_s4 + $0x48] sm:$0xff] (!%p249_p1)  ;;  %v415_v36 = vld [vmem:[%s1366_s4 + $0xd0] sm:$0xff] (!%p249_p1)  ;;  %v1050_v29 = vmov (!%p249_p1), 1.0  }
  0x27   : > { %v416_v37 = vld [vmem:[%s1366_s4 + $0xd8] sm:$0xff] (!%p249_p1)  ;;  %v796_v38 = vpack.c.bf16 (!%p249_p1), %v398_v35, %v397_v34  ;;  %v399_v40 = vld [vmem:[%s1366_s4 + $0x50] sm:$0xff] (!%p249_p1)  ;;  %v417_v42 = vld [vmem:[%s1366_s4 + $0xe0] sm:$0xff] (!%p249_p1) }
  0x28   : > { %s1168_s8 = scalar_select %p294_p2, %s1034_s28, 1  ;;  %785 = vmatpush3.bf16.msra.mxu0 %v784_v14  ;;  %819 = vmatpush3.bf16.msra.mxu1 %v784_v14  ;;  %v798_v39 = vpack.c.bf16 %v416_v37, %v415_v36  ;;  %v400_v41 = vld [vmem:[%s1366_s4 + $0x58] sm:$0xff]  ;;  %v418_v43 = vld [vmem:[%s1366_s4 + $0xe8] sm:$0xff]  ;;  %v401_v47 = vld [vmem:[%s1366_s4 + $0x60] sm:$0xff] }
  0x29   : > { %787 = vmatprep.subr.bf16.mxu0 %v786_v15  ;;  %812 = vmatprep.subr.bf16.mxu1 %v786_v15  ;;  %v800_v44 = vpack.c.bf16 %v400_v41, %v399_v40  ;;  %v802_v46 = vpack.c.bf16 %v418_v43, %v417_v42  ;;  %v402_v48 = vld [vmem:[%s1366_s4 + $0x68] sm:$0xff]  ;;  %v419_v50 = vld [vmem:[%s1366_s4 + $0xf0] sm:$0xff]  ;;  %v420_v51 = vld [vmem:[%s1366_s4 + $0xf8] sm:$0xff] }
  0x2a   : > { %s736_s21 = sshll.u32 %s1168_s8, 4  ;;  %s710_s22 = sshll.u32 %s1168_s8, 3  ;;  %v804_v55 = vpack.c.bf16 %v402_v48, %v401_v47  ;;  %v806_v56 = vpack.c.bf16 %v420_v51, %v419_v50  ;;  %v403_v57 = vld [vmem:[%s1366_s4 + $0x70] sm:$0xff]  ;;  %v404_v58 = vld [vmem:[%s1366_s4 + $0x78] sm:$0xff] }
  0x2b   : > { %s312_s25 = scalar_lea.vmem %s1365_s3, %s736_s21  ;;  %s1190_s12 = scalar_lea.vmem %s1374_s1, %s710_s22  ;;  %v808_v60 = vpack.c.bf16 %v404_v58, %v403_v57 }
  0x2c   : > { %v322_v19 = vld [vmem:[%s312_s25] sm:$0xff]  ;;  %v323_v20 = vld [vmem:[%s312_s25 + $0x8] sm:$0xff]  ;;  %789 = vmatpush3.bf16.msra.mxu0 %v788_v24  ;;  %820 = vmatpush3.bf16.msra.mxu1 %v788_v24  ;;  %s303_s22 = scalar_lea.vmem %s1375_s2, %s1168_s8  ;;  %s1269_s8 = scalar_lea.vmem [#allocation4], %s709_s7 }
  0x2d   : > { %v324_v22 = vmul.f32 0.6931472, %v322_v19  ;;  %v325_v23 = vmul.f32 0.6931472, %v323_v20  ;;  %791 = vmatprep.subr.bf16.mxu0 %v790_v27  ;;  %813 = vmatprep.subr.bf16.mxu1 %v790_v27  ;;  %v316_v31 = vld [vmem:[%s303_s22] sm:$0x1] }
  0x2e   : > { %s1273_s25 = smov 0  }
  0x2f   : > { %v326_v25 = vmul.f32 1.442695, %v324_v22  ;;  %v328_v26 = vmul.f32 1.442695, %v325_v23 }
  0x30   : > { %793 = vmatpush3.bf16.msra.mxu0 %v792_v32  ;;  %821 = vmatpush3.bf16.msra.mxu1 %v792_v32  ;;  %v317_v32 = vmul.f32 0.6931472, %v316_v31 }
  0x31   : > { %904 = vpow2.f32 %v326_v25  ;;  %795 = vmatprep.subr.bf16.mxu0 %v794_v33  ;;  %814 = vmatprep.subr.bf16.mxu1 %v794_v33  ;;  %v368_v25 = vlaneseq }
  0x32   : > { %906 = vpow2.f32 %v328_v26  ;;  %v318_v33 = vmul.f32 1.442695, %v317_v32 }
  0x33   : > { %v369_v26 = vand.u32 127, %v368_v25 }
  0x34   : > { %797 = vmatpush3.bf16.msra.mxu0 %v796_v38  ;;  %822 = vmatpush3.bf16.msra.mxu1 %v796_v38 }
  0x35   : > { %799 = vmatprep.subr.bf16.mxu0 %v798_v39  ;;  %815 = vmatprep.subr.bf16.mxu1 %v798_v39  ;;  %v370_v27 = vadd.s32 128, %v369_v26 }
  0x38   : > { %801 = vmatpush3.bf16.msra.mxu0 %v800_v44  ;;  %823 = vmatpush3.bf16.msra.mxu1 %v800_v44 }
  0x39   : > { %803 = vmatprep.subr.bf16.mxu0 %v802_v46  ;;  %816 = vmatprep.subr.bf16.mxu1 %v802_v46 }
  0x3b   : > { %v905_v45 = vpop.eup %904 }
  0x3c   : > { %v331_v49 = vmul.f32 0.0014285714, %v905_v45  ;;  %v907_v52 = vpop.eup %906  ;;  %805 = vmatpush3.bf16.msra.mxu0 %v804_v55  ;;  %824 = vmatpush3.bf16.msra.mxu1 %v804_v55 }
  0x3d   : > { %v332_v54 = vmul.f32 0.0014285714, %v907_v52  ;;  %807 = vmatprep.subr.bf16.mxu0 %v806_v56  ;;  %817 = vmatprep.subr.bf16.mxu1 %v806_v56 }
  0x3e   : > { %v333_v53 = vadd.f32 1.0, %v331_v49 }
  0x3f   : > { %v334_v59 = vadd.f32 1.0, %v332_v54 }
  0x40   : > { %908 = vlog2.f32 %v333_v53  ;;  %809 = vmatpush3.bf16.msra.mxu0 %v808_v60  ;;  %825 = vmatpush3.bf16.msra.mxu1 %v808_v60 }
  0x41   : > { %910 = vlog2.f32 %v334_v59 }
  0x42   : > { %912 = vpow2.f32 %v318_v33 }
  0x4a   : > { %v909_v61 = vpop.eup %908 }
  0x4b   : > { %v336_v62 = vmul.f32 0.6931472, %v909_v61  ;;  %v911_v63 = vpop.eup %910 }
  0x4c   : > { %v338_v1 = vmul.f32 0.6931472, %v911_v63  ;;  %v913_v34 = vpop.eup %912 }
  0x4d   : > { %v339_v0 = vmul.f32 1127.0, %v336_v62  ;;  %321 = vst.msk [vmem:[%s1369_s24] sm:$0x1] %vm320_vm10, %v913_v34 }
  0x4e   : > { %v340_v3 = vmul.f32 1127.0, %v338_v1 }
  0x4f   : > { %v713_v2 = vadd.f32 -62.627224, %v339_v0  ;;  %vm350_vm0 = vcmp.gt.f32.partialorder %v339_v0, 0.0 }
  0x50   : > { %v714_v5 = vadd.f32 -62.627224, %v340_v3  ;;  %vm351_vm1 = vcmp.gt.f32.partialorder %v340_v3, 0.0 }
  0x51   : > { %v343_v4 = vmul.f32 254.0, %v713_v2 }
  0x52   : > { %v344_v7 = vmul.f32 254.0, %v714_v5 }
  0x53   : > { %v346_v6 = vmul.f32 0.0012558008, %v343_v4 }
  0x54   : > { %v347_v9 = vmul.f32 0.0012558008, %v344_v7 }
  0x55   : > { %v348_v8 = vadd.f32 1.0, %v346_v6 }
  0x56   : > { %v349_v11 = vadd.f32 1.0, %v347_v9 }
  0x57   : > { %v352_v10 = vsel %vm350_vm0, %v348_v8, %v339_v0 }
  0x58   : > { %vm354_vm2 = vcmp.le.f32.partialorder %v352_v10, 1.0  ;;  %v353_v13 = vsel %vm351_vm1, %v349_v11, %v340_v3 }
  0x59   : > { %v356_v12 = vsel %vm354_vm2, 1.0, %v352_v10  ;;  %vm355_vm4 = vcmp.le.f32.partialorder %v353_v13, 1.0 }
  0x5a   : > { %vm358_vm3 = vcmp.gt.f32.partialorder %v356_v12, 255.0  ;;  %v357_v15 = vsel %vm355_vm4, 1.0, %v353_v13 }
  0x5b   : > { %v360_v14 = vsel %vm358_vm3, 255.0, %v356_v12  ;;  %vm359_vm5 = vcmp.gt.f32.partialorder %v357_v15, 255.0 }
  0x5c   : > { %v362_v16 = vadd.f32 0.5, %v360_v14  ;;  %v361_v17 = vsel %vm359_vm5, 255.0, %v357_v15 }
  0x5d   : > { %v363_v19 = vadd.f32 0.5, %v361_v17 }
  0x5e   : > { %v364_v18 = vfloor.f32 %v362_v16 }
  0x5f   : > { %v365_v21 = vfloor.f32 %v363_v19 }
  0x60   : > { %v826_v20 = vtrunc.f32 %v364_v18 }
  0x61   : > { %v828_v23 = vtrunc.f32 %v365_v21 }
  0x62   : > { %v827_v22 = vcvt.f32.s32 %v826_v20 }
  0x63   : > { %v829_v24 = vcvt.f32.s32 %v828_v23 }
  0x64   : > { %372 = vperm.xlu0 %903, %v827_v22  }
  0x68   : > { %375 = vperm.xlu0 %903, %v829_v24  }
  0xe3   : > { %v373_v28 = vpop.permute.xlu0 %372 }
  0xe4   : > { %vm377_vm6 = vcmp.eq.s32.totalorder %v369_v26, %v373_v28  ;;  %vm378_vm7 = vcmp.eq.s32.totalorder %v370_v27, %v373_v28 }
  0xe5   : > { %719 = vmatprep.mubr.msk.f32.mxu0 %vm378_vm7, %v1050_v29 }
  0xe6   : > { %720 = vmatmul.mubr.msk.f32.vlgmr.msra.gmra.mrb[0].mxu0 %vm377_vm6, %v1050_v29 }
  0xe7   : > { %v376_v30 = vpop.permute.xlu0 %375 }
  0xe8   : > { %vm379_vm8 = vcmp.eq.s32.totalorder %v369_v26, %v376_v30  ;;  %vm380_vm9 = vcmp.eq.s32.totalorder %v370_v27, %v376_v30 }
  0xe9   : > { %721 = vmatprep.mubr.msk.f32.mxu1 %vm380_vm9, %v1050_v29 }
  0xea   : > { %722 = vmatmul.mubr.msk.f32.vlgmr.msra.gmra.mrb[0].mxu1 %vm379_vm8, %v1050_v29 }
 0x1b9   : > { %v772_v35 = vpop.f32.mrb[0].mxu0 }
 0x1ba   : > { %v773_v36 = vpop.f32.mrb[1].mxu0 }
 0x1bb   : > { %v774_v37 = vadd.f32 %v773_v36, %v772_v35 }
 0x1bd   : > { %497 = vst.msk [vmem:[%s1269_s8] sm:$0xff] %vm496_vm11, %v774_v37  ;;  %v775_v38 = vpop.f32.mrb[0].mxu1 }
 0x1be   : > { %v776_v39 = vpop.f32.mrb[1].mxu1 }
 0x1bf   : > { %v777_v40 = vadd.f32 %v776_v39, %v775_v38 }
 0x1c1   : > { %498 = vst.msk [vmem:[%s1269_s8 + $0x8] sm:$0xff] %vm496_vm11, %v777_v40 }
 0x1c2 LB: >> { %s506_s10 = sshra.s32 %s1046_s25, 7  ;;  %s511_s15 = sand.u32 127, %s1046_s25  ;;  %vm529_vm12 = vcmask 253952   ;;  %s1046_s25 = sphi %s1273_s25, %s504_s25  }
 0x1c3   : >> { %s508_s16 = sadd.s32 %s1034_s28, %s506_s10  ;;  %s521_s20 = scalar_lea.vmem %s1269_s8, %s1046_s25 [#allocation4] }
 0x1c4   : >> { %s723_s17 = sshll.u32 %s508_s16, 7  ;;  %s504_s25 = sadd.s32 1, %s1046_s25  }
 0x1c5   : >> { %s512_s18 = sadd.s32 %s723_s17, %s511_s15  ;;  %p501_p6 = scmp.ge.s32.totalorder %s504_s25, 16  }
 0x1c6   : >> { %s513_s19 = sld [smem:[#allocation3 + %s512_s18]]  ;;  %s739_s10 = sshll.u32 (%p501_p6), %s1034_s28, 8 }
 0x1c7   : > { %s1285_s17 = scalar_lea.hbm (%p501_p6), %s1367_s5, %s739_s10  ;;  %s532_s18 = scalar_lea.sflag (%p501_p6), [#allocation5], %s1263_s23 }
 0x1c8   : >> { %v522_v41 = vld [vmem:[%s521_s20] sm:$0x1] }
 0x1cc   : >> { %s724_s21 = sadd.s32 4294967295, %s513_s19  ;;  %p523_p3 = scmp.gt.s32.totalorder %s513_s19, 0 }
 0x1cd   : >> { %p515_p4 = scmp.gt.s32.totalorder %s724_s21, 0  ;;  %p725_p5 = scmp.lt.s32.totalorder %s724_s21, 7 }
 0x1ce   : >> { %s524_s22 = scalar_select %p523_p3, 1, 0 }
 0x1cf   : >> { %s1385_s21 = smov (!%p515_p4, %s724_s21), 0 }
 0x1d0   : >> { %s525_s7 = scvt.s32.f32 %s524_s22  ;;  %s1387_s21 = smov (!%p725_p5, %s1385_s21), 7 }
 0x1d1   : >> { %s519_s24 = scalar_lea.vmem %s1190_s12, %s1387_s21  ;;  %503 = sbr.rel (!%p501_p6) target bundleno = 450 (0x1c2), region = 103 }
 0x1d2   : >> { %v520_v42 = vld [vmem:[%s519_s24] sm:$0x1]  ;;  %v527_v43 = vstv %s525_s7  ;;  %s551_s24 = sshll.u32 (%p501_p6), %s1269_s8, 4  ;;  %s1051_s12 = smov (%p501_p6), [#allocation4]   ;;  %s1288_s24 = int_to_ptr.vmem [resolvable:$true] %s551_s24 }
 0x1d3   : >> { %v526_v44 = vadd.f32 %v522_v41, %v520_v42  ;;  %s926_s19 = scalar_lea.vmem (%p501_p6), %s1288_s24, 256  ;;  %s930_s25 = sshll.u32 (%p501_p6), %s1051_s12, 4  ;;  %s931_s25 = int_to_ptr.vmem [resolvable:$false] %s930_s25 }
 0x1d4   : > { %p927_p7 = scmp.ne.s32.totalorder (%p501_p6), %s1288_s24, %s926_s19  ;;  %p933_p11 = scmp.lt.s32.totalorder (%p501_p6), %s1288_s24, %s931_s25 }
 0x1d5   : >> { %v528_v45 = vmul.f32 %v527_v43, %v526_v44 }
 0x1d6   : > { %p928_p8 = pnand (%p501_p6), %p927_p7, %p1133_p9 }
 0x1d7   : >> { %530 = vst.msk [vmem:[%s521_s20] sm:$0x1] %vm529_vm12, %v528_v45  ;;  %s932_s20 = scalar_lea.vmem (%p501_p6), %s931_s25, 512 }
 0x1d8   : > { %p929_p10 = pneg %p928_p8  ;;  %p934_p12 = scmp.lt.s32.totalorder %s932_s20, %s926_s19 }
 0x1da   : > { %p935_p0 = por %p934_p12, %p933_p11 }
 0x1dc   : > { %p936_p1 = pnand %p935_p0, %p929_p10 }
 0x1de   : > { %939 = shalt.err (!%p936_p1)
}
 0x1df   : > { %s940_s8 = scalar_lea.hbm %s1285_s17, 256  ;;  %s944_s7 = scalar_lea.hbm %s1367_s5, 512 }
 0x1e0   : > { %p941_p2 = scmp.ne.s32.totalorder %s1285_s17, %s940_s8  ;;  %p945_p5 = scmp.lt.u32.totalorder %s1285_s17, %s1367_s5 }
 0x1e1   : > { %p946_p6 = scmp.lt.u32.totalorder %s944_s7, %s940_s8  ;;  %p948_p8 = scmp.lt.u32.totalorder %s940_s8, %s1285_s17 }
 0x1e2   : > { %p942_p3 = pnand %p941_p2, %p1133_p9 }
 0x1e3   : > { %p947_p7 = por %p946_p6, %p945_p5 }
 0x1e4   : > { %p943_p4 = pneg %p942_p3 }
 0x1e5   : > { %p949_p10 = por %p948_p8, %p947_p7 }
 0x1e7   : > { %p950_p11 = pnand %p949_p10, %p943_p4 }
 0x1e9   : > { %953 = shalt.err (!%p950_p11)
}
 0x1ea   : > { %s1052_s16 = smov 128   ;;  %s1053_s19 = smov 8  }
 0x1eb   : > { %830 = dma.vmem_to_hbm [thread:$0]  (%p1133_p9), %s1288_s24, 256, %s1285_s17, %s532_s18, %s1052_s16, %s1052_s16, %s1053_s19  }
 0x1ec   : > { %s733_s12 = sshll.u32 %s1034_s28, 4  ;;  %s1376_s25 = scalar_lea.vmem [#allocation6], %s1263_s23 }
 0x1ed   : > { %s568_s20 = sshll.u32 %s1376_s25, 4  ;;  %s1320_s22 = scalar_lea.hbm %s1368_s6, %s733_s12  ;;  %s569_s20 = int_to_ptr.vmem [resolvable:$true] %s568_s20 }
 0x1ee   : > { %s537_s7 = scalar_lea.sflag [#allocation7], %s1263_s23  ;;  %s954_s10 = scalar_lea.vmem %s569_s20, 16 }
 0x1ef   : > { %p955_p12 = scmp.ne.s32.totalorder %s569_s20, %s954_s10  ;;  %s1054_s15 = smov [#allocation6]  }
 0x1f0   : > { %s958_s1 = sshll.u32 %s1054_s15, 4  ;;  %s959_s1 = int_to_ptr.vmem [resolvable:$false] %s958_s1 }
 0x1f1   : > { %p956_p0 = pnand %p955_p12, %p1133_p9  ;;  %s960_s2 = scalar_lea.vmem %s959_s1, 32 }
 0x1f2   : > { %p961_p2 = scmp.lt.s32.totalorder %s569_s20, %s959_s1  ;;  %p962_p3 = scmp.lt.s32.totalorder %s960_s2, %s954_s10 }
 0x1f3   : > { %p957_p1 = pneg %p956_p0 }
 0x1f4   : > { %p963_p4 = por %p962_p3, %p961_p2 }
 0x1f6   : > { %p964_p5 = pnand %p963_p4, %p957_p1 }
 0x1f8   : > { %967 = shalt.err (!%p964_p5)
}
 0x1f9   : > { %s968_s28 = scalar_lea.hbm %s1320_s22, 16  ;;  %s972_s24 = scalar_lea.hbm %s1368_s6, 32 }
 0x1fa   : > { %p969_p6 = scmp.ne.s32.totalorder %s1320_s22, %s968_s28  ;;  %p973_p10 = scmp.lt.u32.totalorder %s1320_s22, %s1368_s6 }
 0x1fb   : > { %p974_p11 = scmp.lt.u32.totalorder %s972_s24, %s968_s28  ;;  %p976_p0 = scmp.lt.u32.totalorder %s968_s28, %s1320_s22 }
 0x1fc   : > { %p970_p7 = pnand %p969_p6, %p1133_p9 }
 0x1fd   : > { %p975_p12 = por %p974_p11, %p973_p10 }
 0x1fe   : > { %p971_p8 = pneg %p970_p7 }
 0x1ff   : > { %p977_p1 = por %p976_p0, %p975_p12 }
 0x201   : > { %p978_p2 = pnand %p977_p1, %p971_p8 }
 0x203   : > { %981 = shalt.err (!%p978_p2)
}
 0x204   : > { %831 = dma.vmem_to_hbm [thread:$0]  (%p1133_p9), %s569_s20, 16, %s1320_s22, %s537_s7  }
 0x205 PF: > { %p841_p3 = scmp.ge.s32.totalorder %s1042_s30, 2  ;;  %s580_s2 = sand.u32 1, %s1022_s26  }
 0x206   : > { %s581_s16 = scalar_lea.sflag [#allocation5], %s580_s2 }
 0x207   : > { %p835_p4 = pnand %p841_p3, %p1140_p13 }
 0x209   : > { %1013 = dma.done.wait (!%p835_p4), %s581_s16, 256  }
 0x20a   : > { %1015 = vsyncadd (!%p835_p4), %s581_s16, 4294967040  ;;  %s590_s19 = scalar_lea.sflag [#allocation7], %s580_s2 }
 0x20b   : > { %1017 = dma.done.wait (!%p835_p4), %s590_s19, 16  }
 0x20c   : > { %1019 = vsyncadd (!%p835_p4), %s590_s19, 4294967280  ;;  %s29_s30 = sadd.s32 1, %s1042_s30   ;;  %s1377_s26 = smov %s1026_s0 }
 0x20d   : > { %p26_p5 = scmp.ge.s32.totalorder %s29_s30, 4   ;;  %s1378_s0 = smov %s1030_s27 }
 0x20e   : > { %s1379_s27 = smov %s1146_s14  ;;  %s1380_s28 = smov %s1038_s29 }
 0x20f   : > { %s1381_s29 = smov %s1383_s9  ;;  %28 = sbr.rel (!%p26_p5) target bundleno = 22 (0x16), region = 114 }
 0x216   :  { %594 = vsyncpa [#allocation5], 1 }
 0x217   :  { %596 = vsyncpa [#allocation5 + $0x1], 1 }
 0x218   :  { %597 = vsyncpa [#allocation7], 1 }
 0x219   :  { %599 = vsyncpa [#allocation7 + $0x1], 1 }

</bundles_post_ra>
